<compile_context>
chip_gen: v7x
topology: tpu7x:2x2x1
jax: 0.10.0
libtpu: 0.0.40
codegen_flags: <defaults>
</compile_context>

<pallas_src>
import functools

import jax
import jax.numpy as jnp
from jax.experimental import pallas as pl
from jax.experimental.pallas import tpu as pltpu

_COMPUTE_DTYPE = jnp.bfloat16   # MXU-native on v6e/v7x; set to jnp.float32 for exact matmuls.

# ConvTranspose2d(k=4, s=2, p=1) phase tables: output row oy = 2*q + dy draws from h rows
# q + _DI[dy][t] through kernel-row taps _KH[dy][t]. Columns use the identical tables.
_DI = ((0, -1), (0, 1))
_KH = ((1, 3), (2, 0))
_DJ = _DI
_KW = _KH


def fold_unet_block_weights(w_down, w_up, compute_dtype=_COMPUTE_DTYPE):
    """Fold conv weights into dense per-phase matmul operands. Call ONCE per weight update.

    w_down: (inner_nc, in_nc, 4, 4)    Conv2d weight           (stride 2, pad 1, no bias)
    w_up:   (inner_nc, outer_nc, 4, 4) ConvTranspose2d weight  (stride 2, pad 1, no bias)
    returns
      wd: (4, 4*in_nc, inner_nc)   wd[da*2+db][(pr,pc,ci), co] = w_down[co, ci, 2da+pr, 2db+pc]
      wu: (16, inner_nc, outer_nc) wu[((dy*2+dx)*2+ti)*2+tj][ci, co]
                                     = w_up[ci, co, _KH[dy][ti], _KW[dx][tj]]
    """
    inner_nc, c_in = w_down.shape[0], w_down.shape[1]
    wd = (w_down.reshape(inner_nc, c_in, 2, 2, 2, 2)      # (co, ci, da, pr, db, pc)
          .transpose(2, 4, 3, 5, 1, 0)                    # (da, db, pr, pc, ci, co)
          .reshape(4, 4 * c_in, inner_nc)
          .astype(compute_dtype))
    blocks = []
    for dy in range(2):
        for dx in range(2):
            for ti in range(2):
                for tj in range(2):
                    blocks.append(w_up[:, :, _KH[dy][ti], _KW[dx][tj]])
    wu = jnp.stack(blocks, axis=0).astype(compute_dtype)  # (16, inner_nc, outer_nc)
    return wd, wu


def _pick_batch_tile(n, spatial, max_rows=2048):
    """Largest divisor of n keeping grid >= 2 steps (v7x megacore) and M within a sane bound."""
    divisors = [d for d in range(1, n + 1) if n % d == 0]
    ok = [d for d in divisors if d * spatial <= max_rows and n // d >= 2]
    return max(ok) if ok else 1


def _unet_block_kernel(xp_ref, wd_ref, wu_ref, out_ref, *,
                       ho, wo, c_in, inner_nc, outer_nc, compute_dtype):
    bt = out_ref.shape[0]
    m = bt * ho * wo                                          # batch-folded matmul M

    # ---- down conv: 4 accumulated dense dots over the 2x2 input-pixel phases -----------
    xp = xp_ref[...].astype(jnp.float32)                      # (bt, ho+1, wo+1, 4*c_in)
    h = jnp.zeros((m, inner_nc), jnp.float32)
    for da in range(2):
        for db in range(2):
            patch = xp[:, da:da + ho, db:db + wo, :].reshape(m, 4 * c_in)
            h = h + jnp.dot(patch.astype(compute_dtype), wd_ref[da * 2 + db],
                            preferred_element_type=jnp.float32)
    h = jnp.maximum(h, 0.0)                                   # LeakyReLU(0.2) then ReLU == ReLU

    # ---- ConvTranspose: 4 output phases x 4 accumulated dense dots on shifted h --------
    h4 = h.reshape(bt, ho, wo, inner_nc)
    zr = jnp.zeros((bt, 1, wo, inner_nc), jnp.float32)
    hp = jnp.concatenate([zr, h4, zr], axis=1)                # (bt, ho+2, wo,   inner_nc)
    zc = jnp.zeros((bt, ho + 2, 1, inner_nc), jnp.float32)
    hp = jnp.concatenate([zc, hp, zc], axis=2)                # (bt, ho+2, wo+2, inner_nc)

    for dy in range(2):
        for dx in range(2):
            acc = jnp.zeros((m, outer_nc), jnp.float32)
            for ti in range(2):
                for tj in range(2):
                    di, dj = _DI[dy][ti], _DJ[dx][tj]
                    hs = hp[:, 1 + di:1 + di + ho, 1 + dj:1 + dj + wo, :].reshape(m, inner_nc)
                    p = ((dy * 2 + dx) * 2 + ti) * 2 + tj
                    acc = acc + jnp.dot(hs.astype(compute_dtype), wu_ref[p],
                                        preferred_element_type=jnp.float32)
            # single contiguous slab store per phase (no per-channel loop)
            out_ref[:, dy * 2 + dx] = acc.reshape(bt, ho, wo, outer_nc)


def unet_skip_block_forward(x, wd, wu, *, b_tile=None, compute_dtype=_COMPUTE_DTYPE):
    """Fused forward of the innermost UNetSkipConnectionBlock (norm_layer=None).

    x:      (N, in_nc, H, W) float32 NCHW
    wd, wu: folded weights from fold_unet_block_weights
    returns (N, in_nc + outer_nc, H, W) float32
    """
    n, c_in, hh, ww = x.shape
    assert hh % 2 == 0 and ww % 2 == 0, "stride-2 conv expects even H and W"
    inner_nc = wd.shape[-1]
    outer_nc = wu.shape[-1]
    assert wd.shape == (4, 4 * c_in, inner_nc), wd.shape
    assert wu.shape == (16, inner_nc, outer_nc), wu.shape
    ho, wo = hh // 2, ww // 2

    if b_tile is None:
        b_tile = _pick_batch_tile(n, ho * wo)
    assert n % b_tile == 0

    # x zero-padded and repacked by 2x2 pixel phase: xp[b, a, c, (pr, pc, ci)]
    #   = x_pad[b, ci, 2a+pr, 2c+pc].  ~x-sized (only the pad ring added); replaces the
    # 2.25x im2col HBM materialization - patches are built inside the kernel.
    xpad = jnp.pad(x, ((0, 0), (0, 0), (1, 1), (1, 1)))
    xp = (xpad.reshape(n, c_in, ho + 1, 2, wo + 1, 2)
          .transpose(0, 2, 4, 3, 5, 1)
          .reshape(n, ho + 1, wo + 1, 4 * c_in)
          .astype(compute_dtype))

    kernel = functools.partial(_unet_block_kernel, ho=ho, wo=wo, c_in=c_in,
                               inner_nc=inner_nc, outer_nc=outer_nc,
                               compute_dtype=compute_dtype)

    y_ph = pl.pallas_call(
        kernel,
        out_shape=jax.ShapeDtypeStruct((n, 4, ho, wo, outer_nc), jnp.float32),
        grid=(n // b_tile,),
        in_specs=[
            pl.BlockSpec((b_tile, ho + 1, wo + 1, 4 * c_in), lambda b: (b, 0, 0, 0)),
            pl.BlockSpec((4, 4 * c_in, inner_nc), lambda b: (0, 0, 0)),    # resident weights
            pl.BlockSpec((16, inner_nc, outer_nc), lambda b: (0, 0, 0)),   # resident weights
        ],
        out_specs=pl.BlockSpec((b_tile, 4, ho, wo, outer_nc), lambda b: (b, 0, 0, 0, 0)),
        compiler_params=pltpu.CompilerParams(dimension_semantics=("parallel",)),
    )(xp, wd, wu)

    # Thin layout plumbing outside the kernel: phase interleave -> NCHW, then skip concat.
    y = (y_ph.reshape(n, 2, 2, ho, wo, outer_nc)     # (b, dy, dx, q, r, co)
         .transpose(0, 5, 3, 1, 4, 2)                # (b, co, q, dy, r, dx)
         .reshape(n, outer_nc, hh, ww))
    return jnp.concatenate([x, y], axis=1)


# -------------------------------------------------------------------------------------
# Reference (pure jax.lax) matching the PyTorch module, for sanity checking
# -------------------------------------------------------------------------------------
def _reference_forward(x, w_down, w_up):
    h = jax.lax.conv_general_dilated(
        x, w_down, window_strides=(2, 2), padding=[(1, 1), (1, 1)],
        dimension_numbers=("NCHW", "OIHW", "NCHW"))
    h = jnp.where(h > 0, h, 0.2 * h)   # LeakyReLU(0.2)
    h = jnp.maximum(h, 0.0)            # ReLU
    w_up_conv = jnp.flip(w_up, axis=(2, 3)).transpose(1, 0, 2, 3)
    y = jax.lax.conv_general_dilated(
        h, w_up_conv, window_strides=(1, 1), padding=[(2, 2), (2, 2)],
        lhs_dilation=(2, 2), dimension_numbers=("NCHW", "OIHW", "NCHW"))
    return jnp.concatenate([x, y], axis=1)


if __name__ == "__main__":
    key = jax.random.PRNGKey(0)
    k_x, k_wd, k_wu = jax.random.split(key, 3)

    N, outer_nc, inner_nc, H, W = 2, 4, 8, 16, 16
    in_nc = outer_nc  # in_nc defaults to outer_nc in the module

    x = jax.random.normal(k_x, (N, in_nc, H, W), dtype=jnp.float32)
    # Conv2d weight: (out=inner_nc, in=in_nc, 4, 4)
    w_down = 0.05 * jax.random.normal(k_wd, (inner_nc, in_nc, 4, 4), dtype=jnp.float32)
    # ConvTranspose2d weight: (in=inner_nc, out=outer_nc, 4, 4)
    w_up = 0.05 * jax.random.normal(k_wu, (inner_nc, outer_nc, 4, 4), dtype=jnp.float32)

    # Fold once per weight update (hoisted out of the per-call jit).
    wd, wu = fold_unet_block_weights(w_down, w_up)

    fwd = jax.jit(unet_skip_block_forward)
    out = jax.block_until_ready(fwd(x, wd, wu))

    ref = _reference_forward(x, w_down, w_up)
    assert out.shape == (N, in_nc + outer_nc, H, W), out.shape
    # bf16 matmul operands with f32 accumulation -> relaxed tolerance vs the f32 reference
    # (skip half is exact; conv-path error is ~1e-3 at these scales).
    assert jnp.allclose(out, ref, atol=2e-2, rtol=2e-2), float(jnp.max(jnp.abs(out - ref)))

    # TODO(synk): norm_layer / Dropout / outermost-Tanh branches of the module are not
    # exercised by this innermost, norm_layer=None configuration.
    print("KERNEL_OK")
</pallas_src>

<mosaic_0001>
module attributes {stable_mosaic.version = 11 : i64} {
  func.func @_unet_block_kernel(%arg0: i32, %arg1: memref<1x9x9x16xbf16, #tpu.memory_space<vmem>>, %arg2: memref<4x16x8xbf16, #tpu.memory_space<vmem>>, %arg3: memref<16x8x4xbf16, #tpu.memory_space<vmem>>, %arg4: memref<1x4x8x8x4xf32, #tpu.memory_space<vmem>>) attributes {dimension_semantics = [#tpu.dimension_semantics<parallel>], iteration_bounds = array<i64: 2>, scalar_prefetch = 0 : i64, scratch_operands = 0 : i64, tpu.core_type = #tpu.core_type<tc>, window_params = [{transform_indices = @transform_0, window_bounds = array<i64: 1, 9, 9, 16>}, {pipeline_mode = #tpu.pipeline_mode<synchronous>, transform_indices = @transform_1, window_bounds = array<i64: 4, 16, 8>}, {pipeline_mode = #tpu.pipeline_mode<synchronous>, transform_indices = @transform_2, window_bounds = array<i64: 16, 8, 4>}, {transform_indices = @transform_3, window_bounds = array<i64: 1, 4, 8, 8, 4>}]} {
    %c0 = arith.constant 0 : index
    %c0_0 = arith.constant 0 : index
    %c0_1 = arith.constant 0 : index
    %c0_2 = arith.constant 0 : index
    %0 = vector.load %arg1[%c0, %c0_0, %c0_1, %c0_2] : memref<1x9x9x16xbf16, #tpu.memory_space<vmem>>, vector<1x9x9x16xbf16>
    %1 = arith.extf %0 : vector<1x9x9x16xbf16> to vector<1x9x9x16xf32>
    %cst = arith.constant 0.000000e+00 : f32
    %2 = vector.broadcast %cst : f32 to vector<64x8xf32>
    %3 = vector.extract_strided_slice %1 {offsets = [0, 0, 0, 0], sizes = [1, 8, 8, 16], strides = [1, 1, 1, 1]} : vector<1x9x9x16xf32> to vector<1x8x8x16xf32>
    %4 = vector.shape_cast %3 : vector<1x8x8x16xf32> to vector<64x16xf32>
    %5 = arith.truncf %4 : vector<64x16xf32> to vector<64x16xbf16>
    %c0_3 = arith.constant 0 : index
    %c0_4 = arith.constant 0 : index
    %c0_5 = arith.constant 0 : index
    %6 = vector.load %arg2[%c0_3, %c0_4, %c0_5] : memref<4x16x8xbf16, #tpu.memory_space<vmem>>, vector<1x16x8xbf16>
    %7 = vector.shape_cast %6 : vector<1x16x8xbf16> to vector<16x8xbf16>
    %cst_6 = arith.constant dense<0.000000e+00> : vector<64x8xf32>
    %8 = tpu.matmul %5, %7, %cst_6 {dimension_numbers = #tpu.dot_dimension_numbers<[1], [0], [0], [1], [0, 0, 1, 1], [], []>} : vector<64x16xbf16>, vector<16x8xbf16>, vector<64x8xf32> -> vector<64x8xf32>
    %9 = arith.addf %2, %8 : vector<64x8xf32>
    %10 = vector.extract_strided_slice %1 {offsets = [0, 0, 1, 0], sizes = [1, 8, 8, 16], strides = [1, 1, 1, 1]} : vector<1x9x9x16xf32> to vector<1x8x8x16xf32>
    %11 = vector.shape_cast %10 : vector<1x8x8x16xf32> to vector<64x16xf32>
    %12 = arith.truncf %11 : vector<64x16xf32> to vector<64x16xbf16>
    %c1 = arith.constant 1 : index
    %c0_7 = arith.constant 0 : index
    %c0_8 = arith.constant 0 : index
    %13 = vector.load %arg2[%c1, %c0_7, %c0_8] : memref<4x16x8xbf16, #tpu.memory_space<vmem>>, vector<1x16x8xbf16>
    %14 = vector.shape_cast %13 : vector<1x16x8xbf16> to vector<16x8xbf16>
    %cst_9 = arith.constant dense<0.000000e+00> : vector<64x8xf32>
    %15 = tpu.matmul %12, %14, %cst_9 {dimension_numbers = #tpu.dot_dimension_numbers<[1], [0], [0], [1], [0, 0, 1, 1], [], []>} : vector<64x16xbf16>, vector<16x8xbf16>, vector<64x8xf32> -> vector<64x8xf32>
    %16 = arith.addf %9, %15 : vector<64x8xf32>
    %17 = vector.extract_strided_slice %1 {offsets = [0, 1, 0, 0], sizes = [1, 8, 8, 16], strides = [1, 1, 1, 1]} : vector<1x9x9x16xf32> to vector<1x8x8x16xf32>
    %18 = vector.shape_cast %17 : vector<1x8x8x16xf32> to vector<64x16xf32>
    %19 = arith.truncf %18 : vector<64x16xf32> to vector<64x16xbf16>
    %c2 = arith.constant 2 : index
    %c0_10 = arith.constant 0 : index
    %c0_11 = arith.constant 0 : index
    %20 = vector.load %arg2[%c2, %c0_10, %c0_11] : memref<4x16x8xbf16, #tpu.memory_space<vmem>>, vector<1x16x8xbf16>
    %21 = vector.shape_cast %20 : vector<1x16x8xbf16> to vector<16x8xbf16>
    %cst_12 = arith.constant dense<0.000000e+00> : vector<64x8xf32>
    %22 = tpu.matmul %19, %21, %cst_12 {dimension_numbers = #tpu.dot_dimension_numbers<[1], [0], [0], [1], [0, 0, 1, 1], [], []>} : vector<64x16xbf16>, vector<16x8xbf16>, vector<64x8xf32> -> vector<64x8xf32>
    %23 = arith.addf %16, %22 : vector<64x8xf32>
    %24 = vector.extract_strided_slice %1 {offsets = [0, 1, 1, 0], sizes = [1, 8, 8, 16], strides = [1, 1, 1, 1]} : vector<1x9x9x16xf32> to vector<1x8x8x16xf32>
    %25 = vector.shape_cast %24 : vector<1x8x8x16xf32> to vector<64x16xf32>
    %26 = arith.truncf %25 : vector<64x16xf32> to vector<64x16xbf16>
    %c3 = arith.constant 3 : index
    %c0_13 = arith.constant 0 : index
    %c0_14 = arith.constant 0 : index
    %27 = vector.load %arg2[%c3, %c0_13, %c0_14] : memref<4x16x8xbf16, #tpu.memory_space<vmem>>, vector<1x16x8xbf16>
    %28 = vector.shape_cast %27 : vector<1x16x8xbf16> to vector<16x8xbf16>
    %cst_15 = arith.constant dense<0.000000e+00> : vector<64x8xf32>
    %29 = tpu.matmul %26, %28, %cst_15 {dimension_numbers = #tpu.dot_dimension_numbers<[1], [0], [0], [1], [0, 0, 1, 1], [], []>} : vector<64x16xbf16>, vector<16x8xbf16>, vector<64x8xf32> -> vector<64x8xf32>
    %30 = arith.addf %23, %29 : vector<64x8xf32>
    %cst_16 = arith.constant 0.000000e+00 : f32
    %31 = vector.broadcast %cst_16 : f32 to vector<64x8xf32>
    %32 = arith.maximumf %30, %31 : vector<64x8xf32>
    %33 = vector.shape_cast %32 : vector<64x8xf32> to vector<1x8x8x8xf32>
    %cst_17 = arith.constant 0.000000e+00 : f32
    %34 = vector.broadcast %cst_17 : f32 to vector<1x1x8x8xf32>
    %35 = tpu.concatenate %34, %33, %34 in 1 : vector<1x1x8x8xf32>, vector<1x8x8x8xf32>, vector<1x1x8x8xf32> -> vector<1x10x8x8xf32>
    %cst_18 = arith.constant 0.000000e+00 : f32
    %36 = vector.broadcast %cst_18 : f32 to vector<1x10x1x8xf32>
    %37 = tpu.concatenate %36, %35, %36 in 2 : vector<1x10x1x8xf32>, vector<1x10x8x8xf32>, vector<1x10x1x8xf32> -> vector<1x10x10x8xf32>
    %cst_19 = arith.constant 0.000000e+00 : f32
    %38 = vector.broadcast %cst_19 : f32 to vector<64x4xf32>
    %39 = vector.extract_strided_slice %37 {offsets = [0, 1, 1, 0], sizes = [1, 8, 8, 8], strides = [1, 1, 1, 1]} : vector<1x10x10x8xf32> to vector<1x8x8x8xf32>
    %40 = vector.shape_cast %39 : vector<1x8x8x8xf32> to vector<64x8xf32>
    %41 = arith.truncf %40 : vector<64x8xf32> to vector<64x8xbf16>
    %c0_20 = arith.constant 0 : index
    %c0_21 = arith.constant 0 : index
    %c0_22 = arith.constant 0 : index
    %42 = vector.load %arg3[%c0_20, %c0_21, %c0_22] : memref<16x8x4xbf16, #tpu.memory_space<vmem>>, vector<1x8x4xbf16>
    %43 = vector.shape_cast %42 : vector<1x8x4xbf16> to vector<8x4xbf16>
    %cst_23 = arith.constant dense<0.000000e+00> : vector<64x4xf32>
    %44 = tpu.matmul %41, %43, %cst_23 {dimension_numbers = #tpu.dot_dimension_numbers<[1], [0], [0], [1], [0, 0, 1, 1], [], []>} : vector<64x8xbf16>, vector<8x4xbf16>, vector<64x4xf32> -> vector<64x4xf32>
    %45 = arith.addf %38, %44 : vector<64x4xf32>
    %46 = vector.extract_strided_slice %37 {offsets = [0, 1, 0, 0], sizes = [1, 8, 8, 8], strides = [1, 1, 1, 1]} : vector<1x10x10x8xf32> to vector<1x8x8x8xf32>
    %47 = vector.shape_cast %46 : vector<1x8x8x8xf32> to vector<64x8xf32>
    %48 = arith.truncf %47 : vector<64x8xf32> to vector<64x8xbf16>
    %c1_24 = arith.constant 1 : index
    %c0_25 = arith.constant 0 : index
    %c0_26 = arith.constant 0 : index
    %49 = vector.load %arg3[%c1_24, %c0_25, %c0_26] : memref<16x8x4xbf16, #tpu.memory_space<vmem>>, vector<1x8x4xbf16>
    %50 = vector.shape_cast %49 : vector<1x8x4xbf16> to vector<8x4xbf16>
    %cst_27 = arith.constant dense<0.000000e+00> : vector<64x4xf32>
    %51 = tpu.matmul %48, %50, %cst_27 {dimension_numbers = #tpu.dot_dimension_numbers<[1], [0], [0], [1], [0, 0, 1, 1], [], []>} : vector<64x8xbf16>, vector<8x4xbf16>, vector<64x4xf32> -> vector<64x4xf32>
    %52 = arith.addf %45, %51 : vector<64x4xf32>
    %53 = vector.extract_strided_slice %37 {offsets = [0, 0, 1, 0], sizes = [1, 8, 8, 8], strides = [1, 1, 1, 1]} : vector<1x10x10x8xf32> to vector<1x8x8x8xf32>
    %54 = vector.shape_cast %53 : vector<1x8x8x8xf32> to vector<64x8xf32>
    %55 = arith.truncf %54 : vector<64x8xf32> to vector<64x8xbf16>
    %c2_28 = arith.constant 2 : index
    %c0_29 = arith.constant 0 : index
    %c0_30 = arith.constant 0 : index
    %56 = vector.load %arg3[%c2_28, %c0_29, %c0_30] : memref<16x8x4xbf16, #tpu.memory_space<vmem>>, vector<1x8x4xbf16>
    %57 = vector.shape_cast %56 : vector<1x8x4xbf16> to vector<8x4xbf16>
    %cst_31 = arith.constant dense<0.000000e+00> : vector<64x4xf32>
    %58 = tpu.matmul %55, %57, %cst_31 {dimension_numbers = #tpu.dot_dimension_numbers<[1], [0], [0], [1], [0, 0, 1, 1], [], []>} : vector<64x8xbf16>, vector<8x4xbf16>, vector<64x4xf32> -> vector<64x4xf32>
    %59 = arith.addf %52, %58 : vector<64x4xf32>
    %60 = vector.extract_strided_slice %37 {offsets = [0, 0, 0, 0], sizes = [1, 8, 8, 8], strides = [1, 1, 1, 1]} : vector<1x10x10x8xf32> to vector<1x8x8x8xf32>
    %61 = vector.shape_cast %60 : vector<1x8x8x8xf32> to vector<64x8xf32>
    %62 = arith.truncf %61 : vector<64x8xf32> to vector<64x8xbf16>
    %c3_32 = arith.constant 3 : index
    %c0_33 = arith.constant 0 : index
    %c0_34 = arith.constant 0 : index
    %63 = vector.load %arg3[%c3_32, %c0_33, %c0_34] : memref<16x8x4xbf16, #tpu.memory_space<vmem>>, vector<1x8x4xbf16>
    %64 = vector.shape_cast %63 : vector<1x8x4xbf16> to vector<8x4xbf16>
    %cst_35 = arith.constant dense<0.000000e+00> : vector<64x4xf32>
    %65 = tpu.matmul %62, %64, %cst_35 {dimension_numbers = #tpu.dot_dimension_numbers<[1], [0], [0], [1], [0, 0, 1, 1], [], []>} : vector<64x8xbf16>, vector<8x4xbf16>, vector<64x4xf32> -> vector<64x4xf32>
    %66 = arith.addf %59, %65 : vector<64x4xf32>
    %67 = vector.shape_cast %66 : vector<64x4xf32> to vector<1x8x8x4xf32>
    %c0_36 = arith.constant 0 : index
    %c0_37 = arith.constant 0 : index
    %c0_38 = arith.constant 0 : index
    %c0_39 = arith.constant 0 : index
    %c0_40 = arith.constant 0 : index
    %68 = vector.load %arg4[%c0_36, %c0_37, %c0_38, %c0_39, %c0_40] : memref<1x4x8x8x4xf32, #tpu.memory_space<vmem>>, vector<1x1x8x8x4xf32>
    %69 = vector.shape_cast %68 : vector<1x1x8x8x4xf32> to vector<1x8x8x4xf32>
    %70 = vector.shape_cast %67 : vector<1x8x8x4xf32> to vector<1x1x8x8x4xf32>
    tpu.vector_store %arg4[%c0_36, %c0_37, %c0_38, %c0_39, %c0_40], %70 {strides = array<i32>} : memref<1x4x8x8x4xf32, #tpu.memory_space<vmem>>, vector<1x1x8x8x4xf32>,
    %cst_41 = arith.constant 0.000000e+00 : f32
    %71 = vector.broadcast %cst_41 : f32 to vector<64x4xf32>
    %72 = vector.extract_strided_slice %37 {offsets = [0, 1, 1, 0], sizes = [1, 8, 8, 8], strides = [1, 1, 1, 1]} : vector<1x10x10x8xf32> to vector<1x8x8x8xf32>
    %73 = vector.shape_cast %72 : vector<1x8x8x8xf32> to vector<64x8xf32>
    %74 = arith.truncf %73 : vector<64x8xf32> to vector<64x8xbf16>
    %c4 = arith.constant 4 : index
    %c0_42 = arith.constant 0 : index
    %c0_43 = arith.constant 0 : index
    %75 = vector.load %arg3[%c4, %c0_42, %c0_43] : memref<16x8x4xbf16, #tpu.memory_space<vmem>>, vector<1x8x4xbf16>
    %76 = vector.shape_cast %75 : vector<1x8x4xbf16> to vector<8x4xbf16>
    %cst_44 = arith.constant dense<0.000000e+00> : vector<64x4xf32>
    %77 = tpu.matmul %74, %76, %cst_44 {dimension_numbers = #tpu.dot_dimension_numbers<[1], [0], [0], [1], [0, 0, 1, 1], [], []>} : vector<64x8xbf16>, vector<8x4xbf16>, vector<64x4xf32> -> vector<64x4xf32>
    %78 = arith.addf %71, %77 : vector<64x4xf32>
    %79 = vector.extract_strided_slice %37 {offsets = [0, 1, 2, 0], sizes = [1, 8, 8, 8], strides = [1, 1, 1, 1]} : vector<1x10x10x8xf32> to vector<1x8x8x8xf32>
    %80 = vector.shape_cast %79 : vector<1x8x8x8xf32> to vector<64x8xf32>
    %81 = arith.truncf %80 : vector<64x8xf32> to vector<64x8xbf16>
    %c5 = arith.constant 5 : index
    %c0_45 = arith.constant 0 : index
    %c0_46 = arith.constant 0 : index
    %82 = vector.load %arg3[%c5, %c0_45, %c0_46] : memref<16x8x4xbf16, #tpu.memory_space<vmem>>, vector<1x8x4xbf16>
    %83 = vector.shape_cast %82 : vector<1x8x4xbf16> to vector<8x4xbf16>
    %cst_47 = arith.constant dense<0.000000e+00> : vector<64x4xf32>
    %84 = tpu.matmul %81, %83, %cst_47 {dimension_numbers = #tpu.dot_dimension_numbers<[1], [0], [0], [1], [0, 0, 1, 1], [], []>} : vector<64x8xbf16>, vector<8x4xbf16>, vector<64x4xf32> -> vector<64x4xf32>
    %85 = arith.addf %78, %84 : vector<64x4xf32>
    %86 = vector.extract_strided_slice %37 {offsets = [0, 0, 1, 0], sizes = [1, 8, 8, 8], strides = [1, 1, 1, 1]} : vector<1x10x10x8xf32> to vector<1x8x8x8xf32>
    %87 = vector.shape_cast %86 : vector<1x8x8x8xf32> to vector<64x8xf32>
    %88 = arith.truncf %87 : vector<64x8xf32> to vector<64x8xbf16>
    %c6 = arith.constant 6 : index
    %c0_48 = arith.constant 0 : index
    %c0_49 = arith.constant 0 : index
    %89 = vector.load %arg3[%c6, %c0_48, %c0_49] : memref<16x8x4xbf16, #tpu.memory_space<vmem>>, vector<1x8x4xbf16>
    %90 = vector.shape_cast %89 : vector<1x8x4xbf16> to vector<8x4xbf16>
    %cst_50 = arith.constant dense<0.000000e+00> : vector<64x4xf32>
    %91 = tpu.matmul %88, %90, %cst_50 {dimension_numbers = #tpu.dot_dimension_numbers<[1], [0], [0], [1], [0, 0, 1, 1], [], []>} : vector<64x8xbf16>, vector<8x4xbf16>, vector<64x4xf32> -> vector<64x4xf32>
    %92 = arith.addf %85, %91 : vector<64x4xf32>
    %93 = vector.extract_strided_slice %37 {offsets = [0, 0, 2, 0], sizes = [1, 8, 8, 8], strides = [1, 1, 1, 1]} : vector<1x10x10x8xf32> to vector<1x8x8x8xf32>
    %94 = vector.shape_cast %93 : vector<1x8x8x8xf32> to vector<64x8xf32>
    %95 = arith.truncf %94 : vector<64x8xf32> to vector<64x8xbf16>
    %c7 = arith.constant 7 : index
    %c0_51 = arith.constant 0 : index
    %c0_52 = arith.constant 0 : index
    %96 = vector.load %arg3[%c7, %c0_51, %c0_52] : memref<16x8x4xbf16, #tpu.memory_space<vmem>>, vector<1x8x4xbf16>
    %97 = vector.shape_cast %96 : vector<1x8x4xbf16> to vector<8x4xbf16>
    %cst_53 = arith.constant dense<0.000000e+00> : vector<64x4xf32>
    %98 = tpu.matmul %95, %97, %cst_53 {dimension_numbers = #tpu.dot_dimension_numbers<[1], [0], [0], [1], [0, 0, 1, 1], [], []>} : vector<64x8xbf16>, vector<8x4xbf16>, vector<64x4xf32> -> vector<64x4xf32>
    %99 = arith.addf %92, %98 : vector<64x4xf32>
    %100 = vector.shape_cast %99 : vector<64x4xf32> to vector<1x8x8x4xf32>
    %c0_54 = arith.constant 0 : index
    %c1_55 = arith.constant 1 : index
    %c0_56 = arith.constant 0 : index
    %c0_57 = arith.constant 0 : index
    %c0_58 = arith.constant 0 : index
    %101 = vector.load %arg4[%c0_54, %c1_55, %c0_56, %c0_57, %c0_58] : memref<1x4x8x8x4xf32, #tpu.memory_space<vmem>>, vector<1x1x8x8x4xf32>
    %102 = vector.shape_cast %101 : vector<1x1x8x8x4xf32> to vector<1x8x8x4xf32>
    %103 = vector.shape_cast %100 : vector<1x8x8x4xf32> to vector<1x1x8x8x4xf32>
    tpu.vector_store %arg4[%c0_54, %c1_55, %c0_56, %c0_57, %c0_58], %103 {strides = array<i32>} : memref<1x4x8x8x4xf32, #tpu.memory_space<vmem>>, vector<1x1x8x8x4xf32>,
    %cst_59 = arith.constant 0.000000e+00 : f32
    %104 = vector.broadcast %cst_59 : f32 to vector<64x4xf32>
    %105 = vector.extract_strided_slice %37 {offsets = [0, 1, 1, 0], sizes = [1, 8, 8, 8], strides = [1, 1, 1, 1]} : vector<1x10x10x8xf32> to vector<1x8x8x8xf32>
    %106 = vector.shape_cast %105 : vector<1x8x8x8xf32> to vector<64x8xf32>
    %107 = arith.truncf %106 : vector<64x8xf32> to vector<64x8xbf16>
    %c8 = arith.constant 8 : index
    %c0_60 = arith.constant 0 : index
    %c0_61 = arith.constant 0 : index
    %108 = vector.load %arg3[%c8, %c0_60, %c0_61] : memref<16x8x4xbf16, #tpu.memory_space<vmem>>, vector<1x8x4xbf16>
    %109 = vector.shape_cast %108 : vector<1x8x4xbf16> to vector<8x4xbf16>
    %cst_62 = arith.constant dense<0.000000e+00> : vector<64x4xf32>
    %110 = tpu.matmul %107, %109, %cst_62 {dimension_numbers = #tpu.dot_dimension_numbers<[1], [0], [0], [1], [0, 0, 1, 1], [], []>} : vector<64x8xbf16>, vector<8x4xbf16>, vector<64x4xf32> -> vector<64x4xf32>
    %111 = arith.addf %104, %110 : vector<64x4xf32>
    %112 = vector.extract_strided_slice %37 {offsets = [0, 1, 0, 0], sizes = [1, 8, 8, 8], strides = [1, 1, 1, 1]} : vector<1x10x10x8xf32> to vector<1x8x8x8xf32>
    %113 = vector.shape_cast %112 : vector<1x8x8x8xf32> to vector<64x8xf32>
    %114 = arith.truncf %113 : vector<64x8xf32> to vector<64x8xbf16>
    %c9 = arith.constant 9 : index
    %c0_63 = arith.constant 0 : index
    %c0_64 = arith.constant 0 : index
    %115 = vector.load %arg3[%c9, %c0_63, %c0_64] : memref<16x8x4xbf16, #tpu.memory_space<vmem>>, vector<1x8x4xbf16>
    %116 = vector.shape_cast %115 : vector<1x8x4xbf16> to vector<8x4xbf16>
    %cst_65 = arith.constant dense<0.000000e+00> : vector<64x4xf32>
    %117 = tpu.matmul %114, %116, %cst_65 {dimension_numbers = #tpu.dot_dimension_numbers<[1], [0], [0], [1], [0, 0, 1, 1], [], []>} : vector<64x8xbf16>, vector<8x4xbf16>, vector<64x4xf32> -> vector<64x4xf32>
    %118 = arith.addf %111, %117 : vector<64x4xf32>
    %119 = vector.extract_strided_slice %37 {offsets = [0, 2, 1, 0], sizes = [1, 8, 8, 8], strides = [1, 1, 1, 1]} : vector<1x10x10x8xf32> to vector<1x8x8x8xf32>
    %120 = vector.shape_cast %119 : vector<1x8x8x8xf32> to vector<64x8xf32>
    %121 = arith.truncf %120 : vector<64x8xf32> to vector<64x8xbf16>
    %c10 = arith.constant 10 : index
    %c0_66 = arith.constant 0 : index
    %c0_67 = arith.constant 0 : index
    %122 = vector.load %arg3[%c10, %c0_66, %c0_67] : memref<16x8x4xbf16, #tpu.memory_space<vmem>>, vector<1x8x4xbf16>
    %123 = vector.shape_cast %122 : vector<1x8x4xbf16> to vector<8x4xbf16>
    %cst_68 = arith.constant dense<0.000000e+00> : vector<64x4xf32>
    %124 = tpu.matmul %121, %123, %cst_68 {dimension_numbers = #tpu.dot_dimension_numbers<[1], [0], [0], [1], [0, 0, 1, 1], [], []>} : vector<64x8xbf16>, vector<8x4xbf16>, vector<64x4xf32> -> vector<64x4xf32>
    %125 = arith.addf %118, %124 : vector<64x4xf32>
    %126 = vector.extract_strided_slice %37 {offsets = [0, 2, 0, 0], sizes = [1, 8, 8, 8], strides = [1, 1, 1, 1]} : vector<1x10x10x8xf32> to vector<1x8x8x8xf32>
    %127 = vector.shape_cast %126 : vector<1x8x8x8xf32> to vector<64x8xf32>
    %128 = arith.truncf %127 : vector<64x8xf32> to vector<64x8xbf16>
    %c11 = arith.constant 11 : index
    %c0_69 = arith.constant 0 : index
    %c0_70 = arith.constant 0 : index
    %129 = vector.load %arg3[%c11, %c0_69, %c0_70] : memref<16x8x4xbf16, #tpu.memory_space<vmem>>, vector<1x8x4xbf16>
    %130 = vector.shape_cast %129 : vector<1x8x4xbf16> to vector<8x4xbf16>
    %cst_71 = arith.constant dense<0.000000e+00> : vector<64x4xf32>
    %131 = tpu.matmul %128, %130, %cst_71 {dimension_numbers = #tpu.dot_dimension_numbers<[1], [0], [0], [1], [0, 0, 1, 1], [], []>} : vector<64x8xbf16>, vector<8x4xbf16>, vector<64x4xf32> -> vector<64x4xf32>
    %132 = arith.addf %125, %131 : vector<64x4xf32>
    %133 = vector.shape_cast %132 : vector<64x4xf32> to vector<1x8x8x4xf32>
    %c0_72 = arith.constant 0 : index
    %c2_73 = arith.constant 2 : index
    %c0_74 = arith.constant 0 : index
    %c0_75 = arith.constant 0 : index
    %c0_76 = arith.constant 0 : index
    %134 = vector.load %arg4[%c0_72, %c2_73, %c0_74, %c0_75, %c0_76] : memref<1x4x8x8x4xf32, #tpu.memory_space<vmem>>, vector<1x1x8x8x4xf32>
    %135 = vector.shape_cast %134 : vector<1x1x8x8x4xf32> to vector<1x8x8x4xf32>
    %136 = vector.shape_cast %133 : vector<1x8x8x4xf32> to vector<1x1x8x8x4xf32>
    tpu.vector_store %arg4[%c0_72, %c2_73, %c0_74, %c0_75, %c0_76], %136 {strides = array<i32>} : memref<1x4x8x8x4xf32, #tpu.memory_space<vmem>>, vector<1x1x8x8x4xf32>,
    %cst_77 = arith.constant 0.000000e+00 : f32
    %137 = vector.broadcast %cst_77 : f32 to vector<64x4xf32>
    %138 = vector.extract_strided_slice %37 {offsets = [0, 1, 1, 0], sizes = [1, 8, 8, 8], strides = [1, 1, 1, 1]} : vector<1x10x10x8xf32> to vector<1x8x8x8xf32>
    %139 = vector.shape_cast %138 : vector<1x8x8x8xf32> to vector<64x8xf32>
    %140 = arith.truncf %139 : vector<64x8xf32> to vector<64x8xbf16>
    %c12 = arith.constant 12 : index
    %c0_78 = arith.constant 0 : index
    %c0_79 = arith.constant 0 : index
    %141 = vector.load %arg3[%c12, %c0_78, %c0_79] : memref<16x8x4xbf16, #tpu.memory_space<vmem>>, vector<1x8x4xbf16>
    %142 = vector.shape_cast %141 : vector<1x8x4xbf16> to vector<8x4xbf16>
    %cst_80 = arith.constant dense<0.000000e+00> : vector<64x4xf32>
    %143 = tpu.matmul %140, %142, %cst_80 {dimension_numbers = #tpu.dot_dimension_numbers<[1], [0], [0], [1], [0, 0, 1, 1], [], []>} : vector<64x8xbf16>, vector<8x4xbf16>, vector<64x4xf32> -> vector<64x4xf32>
    %144 = arith.addf %137, %143 : vector<64x4xf32>
    %145 = vector.extract_strided_slice %37 {offsets = [0, 1, 2, 0], sizes = [1, 8, 8, 8], strides = [1, 1, 1, 1]} : vector<1x10x10x8xf32> to vector<1x8x8x8xf32>
    %146 = vector.shape_cast %145 : vector<1x8x8x8xf32> to vector<64x8xf32>
    %147 = arith.truncf %146 : vector<64x8xf32> to vector<64x8xbf16>
    %c13 = arith.constant 13 : index
    %c0_81 = arith.constant 0 : index
    %c0_82 = arith.constant 0 : index
    %148 = vector.load %arg3[%c13, %c0_81, %c0_82] : memref<16x8x4xbf16, #tpu.memory_space<vmem>>, vector<1x8x4xbf16>
    %149 = vector.shape_cast %148 : vector<1x8x4xbf16> to vector<8x4xbf16>
    %cst_83 = arith.constant dense<0.000000e+00> : vector<64x4xf32>
    %150 = tpu.matmul %147, %149, %cst_83 {dimension_numbers = #tpu.dot_dimension_numbers<[1], [0], [0], [1], [0, 0, 1, 1], [], []>} : vector<64x8xbf16>, vector<8x4xbf16>, vector<64x4xf32> -> vector<64x4xf32>
    %151 = arith.addf %144, %150 : vector<64x4xf32>
    %152 = vector.extract_strided_slice %37 {offsets = [0, 2, 1, 0], sizes = [1, 8, 8, 8], strides = [1, 1, 1, 1]} : vector<1x10x10x8xf32> to vector<1x8x8x8xf32>
    %153 = vector.shape_cast %152 : vector<1x8x8x8xf32> to vector<64x8xf32>
    %154 = arith.truncf %153 : vector<64x8xf32> to vector<64x8xbf16>
    %c14 = arith.constant 14 : index
    %c0_84 = arith.constant 0 : index
    %c0_85 = arith.constant 0 : index
    %155 = vector.load %arg3[%c14, %c0_84, %c0_85] : memref<16x8x4xbf16, #tpu.memory_space<vmem>>, vector<1x8x4xbf16>
    %156 = vector.shape_cast %155 : vector<1x8x4xbf16> to vector<8x4xbf16>
    %cst_86 = arith.constant dense<0.000000e+00> : vector<64x4xf32>
    %157 = tpu.matmul %154, %156, %cst_86 {dimension_numbers = #tpu.dot_dimension_numbers<[1], [0], [0], [1], [0, 0, 1, 1], [], []>} : vector<64x8xbf16>, vector<8x4xbf16>, vector<64x4xf32> -> vector<64x4xf32>
    %158 = arith.addf %151, %157 : vector<64x4xf32>
    %159 = vector.extract_strided_slice %37 {offsets = [0, 2, 2, 0], sizes = [1, 8, 8, 8], strides = [1, 1, 1, 1]} : vector<1x10x10x8xf32> to vector<1x8x8x8xf32>
    %160 = vector.shape_cast %159 : vector<1x8x8x8xf32> to vector<64x8xf32>
    %161 = arith.truncf %160 : vector<64x8xf32> to vector<64x8xbf16>
    %c15 = arith.constant 15 : index
    %c0_87 = arith.constant 0 : index
    %c0_88 = arith.constant 0 : index
    %162 = vector.load %arg3[%c15, %c0_87, %c0_88] : memref<16x8x4xbf16, #tpu.memory_space<vmem>>, vector<1x8x4xbf16>
    %163 = vector.shape_cast %162 : vector<1x8x4xbf16> to vector<8x4xbf16>
    %cst_89 = arith.constant dense<0.000000e+00> : vector<64x4xf32>
    %164 = tpu.matmul %161, %163, %cst_89 {dimension_numbers = #tpu.dot_dimension_numbers<[1], [0], [0], [1], [0, 0, 1, 1], [], []>} : vector<64x8xbf16>, vector<8x4xbf16>, vector<64x4xf32> -> vector<64x4xf32>
    %165 = arith.addf %158, %164 : vector<64x4xf32>
    %166 = vector.shape_cast %165 : vector<64x4xf32> to vector<1x8x8x4xf32>
    %c0_90 = arith.constant 0 : index
    %c3_91 = arith.constant 3 : index
    %c0_92 = arith.constant 0 : index
    %c0_93 = arith.constant 0 : index
    %c0_94 = arith.constant 0 : index
    %167 = vector.load %arg4[%c0_90, %c3_91, %c0_92, %c0_93, %c0_94] : memref<1x4x8x8x4xf32, #tpu.memory_space<vmem>>, vector<1x1x8x8x4xf32>
    %168 = vector.shape_cast %167 : vector<1x1x8x8x4xf32> to vector<1x8x8x4xf32>
    %169 = vector.shape_cast %166 : vector<1x8x8x4xf32> to vector<1x1x8x8x4xf32>
    tpu.vector_store %arg4[%c0_90, %c3_91, %c0_92, %c0_93, %c0_94], %169 {strides = array<i32>} : memref<1x4x8x8x4xf32, #tpu.memory_space<vmem>>, vector<1x1x8x8x4xf32>,
    return
  }
  func.func @transform_0(%arg0: i32) -> (i32, i32, i32, i32) {
    %c0_i32 = arith.constant 0 : i32
    %c0_i32_0 = arith.constant 0 : i32
    %c0_i32_1 = arith.constant 0 : i32
    %c0_i32_2 = arith.constant 0 : i32
    return %arg0, %c0_i32, %c0_i32_0, %c0_i32_1 : i32, i32, i32, i32
  }
  func.func @transform_1(%arg0: i32) -> (i32, i32, i32) {
    %c0_i32 = arith.constant 0 : i32
    %c0_i32_0 = arith.constant 0 : i32
    %c0_i32_1 = arith.constant 0 : i32
    %c0_i32_2 = arith.constant 0 : i32
    return %c0_i32, %c0_i32_0, %c0_i32_1 : i32, i32, i32
  }
  func.func @transform_2(%arg0: i32) -> (i32, i32, i32) {
    %c0_i32 = arith.constant 0 : i32
    %c0_i32_0 = arith.constant 0 : i32
    %c0_i32_1 = arith.constant 0 : i32
    %c0_i32_2 = arith.constant 0 : i32
    return %c0_i32, %c0_i32_0, %c0_i32_1 : i32, i32, i32
  }
  func.func @transform_3(%arg0: i32) -> (i32, i32, i32, i32, i32) {
    %c0_i32 = arith.constant 0 : i32
    %c0_i32_0 = arith.constant 0 : i32
    %c0_i32_1 = arith.constant 0 : i32
    %c0_i32_2 = arith.constant 0 : i32
    %c0_i32_3 = arith.constant 0 : i32
    return %arg0, %c0_i32, %c0_i32_0, %c0_i32_1, %c0_i32_2 : i32, i32, i32, i32, i32
  }
}

</mosaic_0001>

<bundles_post_ra>
// kernel: unet_skip_block_forward.1
= control target key start
LH: loop header
LB: loop body
LE: loop exit
PB: predicated region body
PF: predicated region fallthrough
CT: control target
= control target key end

     0   :  { %s2803_s12 = smov 0   ;;  %s3344_s0 = inlined_call_operand.vmem [shape: bf16[2,9,9,16], index: 0, kind: input, shape index: {}]   ;;  %s3345_s1 = inlined_call_operand.vmem [shape: bf16[4,16,8], index: 1, kind: input, shape index: {}]   ;;  %s3346_s2 = inlined_call_operand.vmem [shape: bf16[16,8,4], index: 2, kind: input, shape index: {}]   ;;  %s3347_s3 = inlined_call_operand.vmem [shape: f32[2,4,8,8,4], index: 3, kind: output, shape index: {}]  }
   0x1 LB: > { %s2168_s13 = sadd.s32 4294967295, %s2780_s12   ;;  %p2172_p0 = scmp.ge.s32.totalorder %s2780_s12, 1  ;;  %s2780_s12 = sphi %s2803_s12, %s13_s12  }
   0x2   : > { %p137_p1 = scmp.lt.s32.totalorder %s2780_s12, 3 }
   0x4   : > { %p138_p2 = pnand %p2172_p0, %p137_p1 }
   0x5   : > { %v2762_v0 = vld [vmem:[%s3345_s1 + $0x10] sm:$0xff] (!%p138_p2)   ;;  %p161_p3 = scmp.lt.s32.totalorder (!%p138_p2), %s2168_s13, 1  ;;  %v2766_v1 = vld [vmem:[%s3345_s1 + $0x8] sm:$0xff] (!%p138_p2)   ;;  %v2822_v2 = vld [vmem:[%s3345_s1] sm:$0xff] (!%p138_p2)   ;;  %vm276_vm0 = vcmask (!%p138_p2), 130048   ;;  %vm230_vm1 = vcmask (!%p138_p2), 1046528  }
   0x6   : > { %141 = sbr.rel (%p138_p2) target bundleno = 615 (0x267), region = 32  ;;  %2436 = vmatprep.subr.bf16.mxu0 (!%p138_p2), %v2762_v0  ;;  %2416 = vmatprep.subr.bf16.mxu1 (!%p138_p2), %v2766_v1  ;;  %v2769_v3 = vld [vmem:[%s3345_s1 + $0x18] sm:$0xff] (!%p138_p2)   ;;  %vm765_vm2 = vcmask (!%p138_p2), 1043456   ;;  %vm674_vm3 = vcmask (!%p138_p2), 1040384   ;;  %vm1119_vm4 = vcmask (!%p138_p2), 1045504   ;;  %vm752_vm5 = vcmask (!%p138_p2), 64512  }
   0x7   : > { %2437 = vmatpush3.bf16.msra.mxu0 (!%p138_p2), %v2762_v0  ;;  %2417 = vmatpush3.bf16.msra.mxu1 (!%p138_p2), %v2766_v1  ;;  %vm1108_vm6 = vcmask (!%p138_p2), 31744  }
   0x8   : > { %2426 = vmatprep.subr.bf16.mxu1 (!%p138_p2), %v2822_v2  ;;  %2446 = vmatprep.subr.bf16.mxu0 (!%p138_p2), %v2769_v3 }
   0xd   : > { %s3349_s13 = smov (!%p161_p3, %s2168_s13), 1 }
   0xe   : > { %s2752_s20 = smul.u32 72, %s3349_s13  ;;  %s2315_s6 = sshll.u32 %s3349_s13, 8 }
   0xf   : > { %s3275_s9 = scalar_lea.vmem %s3347_s3, %s2315_s6 }
  0x10   : > { %s2832_s25 = scalar_lea.vmem %s3344_s0, %s2752_s20 }
  0x11   : > { %v2835_v4 = vld [vmem:[%s2832_s25] sm:$0xf]  ;;  %v2838_v5 = vld [vmem:[%s2832_s25 + $0x8] sm:$0xf]  ;;  %v2841_v6 = vld [vmem:[%s2832_s25 + $0x10] sm:$0xf] }
  0x12   : > { %v2844_v7 = vld [vmem:[%s2832_s25 + $0x18] sm:$0xf]  ;;  %v192_v8 = vunpack.c.l.bf16 %v2838_v5  ;;  %v194_v9 = vunpack.c.l.bf16 %v2841_v6  ;;  %v2192_v10 = vcombine.low %v2838_v5, %v2841_v6  ;;  %v2851_v11 = vld [vmem:[%s2832_s25 + $0x20] sm:$0xf]  ;;  %v173_v12 = vld [vmem:[%s2832_s25 + $0x4] sm:$0x1]  ;;  %v190_v21 = vunpack.c.l.bf16 %v2835_v4 }
  0x13   : > { %v196_v13 = vunpack.c.l.bf16 %v2844_v7  ;;  %v2193_v14 = vcombine.low %v2844_v7, %v2851_v11  ;;  %v175_v15 = vld [vmem:[%s2832_s25 + $0xc] sm:$0x1]  ;;  %v177_v16 = vld [vmem:[%s2832_s25 + $0x14] sm:$0x1]  ;;  %v179_v17 = vld [vmem:[%s2832_s25 + $0x1c] sm:$0x1]  ;;  %v198_v19 = vunpack.c.l.bf16 %v2851_v11  ;;  %v191_v22 = vunpack.c.l.bf16 %v173_v12 }
  0x14   : > { %v234_v18 = vrot.slane %v192_v8, 1  ;;  %2438 = vmatprep.mubr.msk.bf16.mxu0 %vm276_vm0, %v2192_v10  ;;  %v181_v20 = vld [vmem:[%s2832_s25 + $0x24] sm:$0x1]  ;;  %v2865_v23 = vld [vmem:[%s2832_s25 + $0x28] sm:$0xf]  ;;  %v237_v24 = vrot.slane %v194_v9, 1  ;;  %v193_v25 = vunpack.c.l.bf16 %v175_v15  ;;  %v195_v26 = vunpack.c.l.bf16 %v177_v16 }
  0x15   : > { %2439 = vmatmul.mubr.msk.bf16.vlgmr.msra.gmra.mrb[0].mxu0 %vm276_vm0, %v2193_v14  ;;  %v197_v27 = vunpack.c.l.bf16 %v179_v17  ;;  %v2869_v28 = vld [vmem:[%s2832_s25 + $0x30] sm:$0xf]  ;;  %v199_v29 = vunpack.c.l.bf16 %v181_v20  ;;  %v231_v30 = vrot.slane %v190_v21, 1  ;;  %v232_v31 = vrot.slane %v191_v22, 1  ;;  %v186_v40 = vld [vmem:[%s2832_s25 + $0x38] sm:$0xf] }
  0x16   : > { %v240_v32 = vrot.slane %v196_v13, 1  ;;  %2447 = vmatpush3.bf16.msra.mxu0 %v2769_v3  ;;  %v235_v33 = vrot.slane %v193_v25, 1  ;;  %v238_v34 = vrot.slane %v195_v26, 1  ;;  %v200_v36 = vunpack.c.l.bf16 %v2865_v23  ;;  %v188_v41 = vld [vmem:[%s2832_s25 + $0x40] sm:$0xf] }
  0x17   : > { %v241_v35 = vrot.slane %v197_v27, 1  ;;  %v233_v37 = vsel %vm230_vm1, %v231_v30, %v232_v31  ;;  %v202_v38 = vunpack.c.l.bf16 %v2869_v28  ;;  %v2194_v39 = vcombine.low %v2865_v23, %v2869_v28  ;;  %v183_v45 = vld [vmem:[%s2832_s25 + $0x2c] sm:$0x1]  ;;  %v185_v46 = vld [vmem:[%s2832_s25 + $0x34] sm:$0x1] }
  0x18   : > { %v236_v42 = vsel %vm230_vm1, %v234_v18, %v235_v33  ;;  %v239_v43 = vsel %vm230_vm1, %v237_v24, %v238_v34  ;;  %v187_v47 = vld [vmem:[%s2832_s25 + $0x3c] sm:$0x1]  ;;  %v243_v48 = vrot.slane %v198_v19, 1  ;;  %v244_v49 = vrot.slane %v199_v29, 1  ;;  %v189_v60 = vld [vmem:[%s2832_s25 + $0x44] sm:$0x1] }
  0x19   : > { %v242_v44 = vsel %vm230_vm1, %v240_v32, %v241_v35  ;;  %v263_v50 = vpack.c.bf16 %v236_v42, %v233_v37  ;;  %2442 = vmatprep.mubr.msk.bf16.mxu0 %vm276_vm0, %v2194_v39  ;;  %v541_v52 = vpack.c.bf16 %v239_v43, %v236_v42  ;;  %v246_v53 = vrot.slane %v200_v36, 1  ;;  %v2210_v22 = vld [vmem:[%s3346_s2 + $0x4] sm:$0xf]  ;;  %v2229_v24 = vld [vmem:[%s3346_s2 + $0x10] sm:$0xf] }
  0x1a   : > { %v264_v51 = vpack.c.bf16 %v242_v44, %v239_v43  ;;  %v249_v54 = vrot.slane %v202_v38, 1  ;;  %v204_v55 = vunpack.c.l.bf16 %v186_v40  ;;  %v2195_v56 = vcombine.low %v186_v40, %v188_v41 }
  0x1b   : > { %2418 = vmatprep.mubr.msk.bf16.mxu1 %vm276_vm0, %v263_v50  ;;  %v201_v57 = vunpack.c.l.bf16 %v183_v45  ;;  %v203_v58 = vunpack.c.l.bf16 %v185_v46  ;;  %v205_v59 = vunpack.c.l.bf16 %v187_v47  ;;  %v245_v62 = vsel %vm230_vm1, %v243_v48, %v244_v49 }
  0x1c   : > { %2419 = vmatmul.mubr.msk.bf16.vlgmr.msra.gmra.mrb[0].mxu1 %vm276_vm0, %v264_v51  ;;  %v252_v61 = vrot.slane %v204_v55, 1  ;;  %v206_v3 = vunpack.c.l.bf16 %v188_v41  ;;  %v207_v8 = vunpack.c.l.bf16 %v189_v60  ;;  %v542_v15 = vpack.c.bf16 %v245_v62, %v242_v44 }
  0x1d   : > { %2427 = vmatpush3.bf16.msra.mxu1 %v2822_v2  ;;  %2443 = vmatmul.mubr.msk.bf16.gmra.mrb[4].mxu0 %vm276_vm0, %v2195_v56  ;;  %v247_v63 = vrot.slane %v201_v57, 1  ;;  %v250_v0 = vrot.slane %v203_v58, 1  ;;  %v253_v1 = vrot.slane %v205_v59, 1  ;;  %v2176_v2 = vcombine.low %v2835_v4, %v2838_v5 }
  0x1e   : > { %2448 = vmatprep.mubr.msk.bf16.mxu0 %vm276_vm0, %v541_v52  ;;  %v537_v16 = vrot.slane %v206_v3, 1  ;;  %v538_v18 = vrot.slane %v207_v8, 1  ;;  %v2177_v20 = vcombine.low %v2841_v6, %v2844_v7  ;;  %v2178_v5 = vcombine.low %v2851_v11, %v2865_v23  ;;  %2736 = vmatprep.subr.msk.bf16.mxu1 %vm765_vm2, %v2210_v22  ;;  %v2230_v6 = vld [vmem:[%s3346_s2 + $0x14] sm:$0xf]  ;;  %v745_v23 = vld [vmem:[%s3346_s2] sm:$0xf] }
  0x1f   : > { %v248_v9 = vsel %vm230_vm1, %v246_v53, %v247_v63  ;;  %v251_v10 = vsel %vm230_vm1, %v249_v54, %v250_v0  ;;  %v254_v12 = vsel %vm230_vm1, %v252_v61, %v253_v1  ;;  %v2179_v21 = vcombine.low %v2869_v28, %v186_v40  ;;  %2740 = vmatprep.subr.msk.bf16.mxu0 %vm765_vm2, %v2230_v6 }
  0x20   : > { %v265_v13 = vpack.c.bf16 %v248_v9, %v245_v62  ;;  %v266_v14 = vpack.c.bf16 %v254_v12, %v251_v10  ;;  %v543_v17 = vpack.c.bf16 %v251_v10, %v248_v9  ;;  %v539_v19 = vsel %vm230_vm1, %v537_v16, %v538_v18 }
  0x21   : > { %v544_v4 = vpack.c.bf16 %v539_v19, %v254_v12  ;;  %v767_v7 = vsel %vm765_vm2, %v2210_v22, 0  ;;  %v1171_v11 = vsel %vm765_vm2, %v2230_v6, 0  ;;  %v2782_v29 = vmov 0.0  }
  0x22   : > { %2422 = vmatprep.mubr.msk.bf16.mxu1 %vm276_vm0, %v265_v13  ;;  %v656_v30 = vrot.slane %v2782_v29, 7  ;;  %v2938_v50 = vsel %vm765_vm2, %v745_v23, 0  ;;  %v2942_v53 = vsel %vm765_vm2, %v2229_v24, 0 }
  0x24   : > { %2423 = vmatmul.mubr.msk.bf16.gmra.mrb[4].mxu1 %vm276_vm0, %v266_v14  ;;  %v2931_v35 = vsel %vm674_vm3, 0.0, %v656_v30  ;;  %v2934_v39 = vsel %vm674_vm3, %v656_v30, 0.0 }
  0x25   : > { %2449 = vmatmul.mubr.msk.bf16.vlgmr.msra.gmra.mrb[0].mxu0 %vm276_vm0, %v542_v15  ;;  %2428 = vmatprep.mubr.msk.bf16.mxu1 %vm276_vm0, %v2176_v2  ;;  %v916_v47 = vrot.slane %v2931_v35, 1  ;;  %v917_v51 = vrot.slane %v2934_v39, 1  ;;  %v1384_v54 = vrot.slane %v2931_v35, 2  ;;  %v1385_v55 = vrot.slane %v2934_v39, 2 }
  0x26   : > { %2452 = vmatprep.mubr.msk.bf16.mxu0 %vm276_vm0, %v543_v17  ;;  %2497 = vmatpush3.bf16.msra.mxu0 %v1171_v11 }
  0x27   : > { %2741 = vmatprep.subr.msk.bf16.mxu0 %vm765_vm2, %v2229_v24 }
  0x2c   : > { %2429 = vmatmul.mubr.msk.bf16.vlgmr.msra.gmra.mrb[0].mxu1 %vm276_vm0, %v2177_v20 }
  0x2d   : > { %2453 = vmatmul.mubr.msk.bf16.gmra.mrb[4].mxu0 %vm276_vm0, %v544_v4  ;;  %2432 = vmatprep.mubr.msk.bf16.mxu1 %vm276_vm0, %v2178_v5 }
  0x2e   : > { %2457 = vmatpush3.bf16.msra.mxu1 %v767_v7 }
  0x2f   : > { %2737 = vmatprep.subr.msk.bf16.mxu1 %vm765_vm2, %v745_v23 }
  0x34   : > { %2433 = vmatmul.mubr.msk.bf16.gmra.mrb[4].mxu1 %vm276_vm0, %v2179_v21 }
  0xf8   : > { %v2450_v25 = vpop.f32.mrb[0].mxu0 }
  0xf9   : > { %v600_v26 = vpop.f32.mrb[1].mxu0 }
  0xfa   : > { %v2451_v27 = vpop.f32.mrb[2].mxu0 }
  0xfb   : > { %v603_v28 = vpop.f32.mrb[3].mxu0 }
  0xff   : > { %v2430_v31 = vpop.f32.mrb[0].mxu1 }
 0x100   : > { %v2616_v32 = vadd.f32 %v2450_v25, %v2430_v31  ;;  %v406_v33 = vpop.f32.mrb[1].mxu1  ;;  %v2454_v34 = vpop.f32.mrb[4].mxu0 }
 0x101   : > { %v2617_v36 = vadd.f32 %v600_v26, %v406_v33  ;;  %v2431_v37 = vpop.f32.mrb[2].mxu1  ;;  %v616_v38 = vpop.f32.mrb[5].mxu0 }
 0x102   : > { %v641_v40 = vmax.f32 %v2616_v32, 0.0  ;;  %v2618_v41 = vadd.f32 %v2451_v27, %v2431_v37  ;;  %v409_v42 = vpop.f32.mrb[3].mxu1  ;;  %v2455_v43 = vpop.f32.mrb[6].mxu0 }
 0x103   : > { %v639_v44 = vmax.f32 %v2617_v36, 0.0  ;;  %v2619_v45 = vadd.f32 %v603_v28, %v409_v42  ;;  %v619_v46 = vpop.f32.mrb[7].mxu0 }
 0x104   : > { %v659_v48 = vrot.slane %v641_v40, 7  ;;  %v642_v49 = vmax.f32 %v2618_v41, 0.0 }
 0x105   : > { %v657_v52 = vrot.slane %v639_v44, 7  ;;  %v640_v59 = vmax.f32 %v2619_v45, 0.0 }
 0x106   : > { %v678_v56 = vsel %vm674_vm3, 0.0, %v659_v48  ;;  %v687_v57 = vsel %vm674_vm3, %v659_v48, 0.0  ;;  %v660_v58 = vrot.slane %v642_v49, 7 }
 0x107   : > { %v715_v60 = vrot.slane %v678_v56, 1  ;;  %v716_v61 = vrot.slane %v687_v57, 1  ;;  %v1126_v62 = vrot.slane %v678_v56, 2  ;;  %v1127_v63 = vrot.slane %v687_v57, 2  ;;  %v2434_v0 = vpop.f32.mrb[4].mxu1 }
 0x108   : > { %v2949_v1 = vsel %vm674_vm3, 0.0, %v657_v52  ;;  %v685_v3 = vsel %vm674_vm3, %v657_v52, 0.0  ;;  %v2953_v8 = vsel %vm674_vm3, 0.0, %v660_v58  ;;  %v688_v9 = vsel %vm674_vm3, %v660_v58, 0.0  ;;  %v422_v10 = vpop.f32.mrb[5].mxu1 }
 0x109   : > { %v2957_v12 = vsel %vm230_vm1, %v715_v60, %v716_v61  ;;  %v1128_v13 = vsel %vm1119_vm4, %v1126_v62, %v1127_v63  ;;  %v709_v14 = vrot.slane %v2949_v1, 1  ;;  %v710_v2 = vrot.slane %v685_v3, 1  ;;  %v2435_v15 = vpop.f32.mrb[6].mxu1 }
 0x10a   : > { %v1120_v16 = vrot.slane %v2949_v1, 2  ;;  %v1121_v17 = vrot.slane %v685_v3, 2  ;;  %v718_v18 = vrot.slane %v2953_v8, 1  ;;  %v719_v19 = vrot.slane %v688_v9, 1  ;;  %v425_v20 = vpop.f32.mrb[7].mxu1 }
 0x10b   : > { %v2964_v4 = vpack.c.bf16 %v2953_v8, %v678_v56  ;;  %v1129_v5 = vrot.slane %v2953_v8, 2  ;;  %v1130_v21 = vrot.slane %v688_v9, 2  ;;  %v658_v22 = vrot.slane %v640_v59, 7  ;;  %v2239_v3 = vld [vmem:[%s3346_s2 + $0x18] sm:$0xf] }
 0x10c   : > { %v2968_v6 = vsel %vm230_vm1, %v718_v18, %v719_v19  ;;  %v2620_v7 = vadd.f32 %v2454_v34, %v2434_v0  ;;  %v2621_v11 = vadd.f32 %v616_v38, %v422_v10  ;;  %v2622_v23 = vadd.f32 %v2455_v43, %v2435_v15 }
 0x10d   : > { %v2972_v24 = vpack.c.bf16 %v2968_v6, %v2957_v12  ;;  %v2975_v25 = vsel %vm1119_vm4, %v1129_v5, %v1130_v21  ;;  %v677_v26 = vsel %vm674_vm3, 0.0, %v658_v22  ;;  %v686_v27 = vsel %vm674_vm3, %v658_v22, 0.0 }
 0x10e   : > { %v2980_v28 = vpack.c.bf16 %v2975_v25, %v1128_v13  ;;  %v712_v29 = vrot.slane %v677_v26, 1  ;;  %v713_v30 = vrot.slane %v686_v27, 1  ;;  %v2982_v31 = vpack.c.bf16 %v678_v56, %v677_v26  ;;  %v3004_v56 = vld [vmem:[%s3346_s2 + $0x8] sm:$0xf] }
 0x10f   : > { %v1123_v32 = vrot.slane %v677_v26, 2  ;;  %v1124_v33 = vrot.slane %v686_v27, 2  ;;  %v645_v34 = vmax.f32 %v2620_v7, 0.0  ;;  %v643_v36 = vmax.f32 %v2621_v11, 0.0 }
 0x110   : > { %v646_v37 = vmax.f32 %v2622_v23, 0.0  ;;  %v2623_v38 = vadd.f32 %v619_v46, %v425_v20  ;;  %v2985_v40 = vpack.c.bf16 %v677_v26, %v2949_v1  ;;  %v2988_v41 = vsel %vm1119_vm4, %v1120_v16, %v1121_v17 }
 0x111   : > { %v663_v42 = vrot.slane %v645_v34, 7  ;;  %v661_v43 = vrot.slane %v643_v36, 7  ;;  %v1125_v44 = vsel %vm1119_vm4, %v1123_v32, %v1124_v33  ;;  %v2992_v45 = vsel %vm230_vm1, %v709_v14, %v710_v2 }
 0x112   : > { %v664_v48 = vrot.slane %v646_v37, 7  ;;  %v644_v49 = vmax.f32 %v2623_v38, 0.0  ;;  %2458 = vmatprep.mubr.msk.bf16.mxu1 %vm752_vm5, %v2985_v40  ;;  %v2997_v46 = vpack.c.bf16 %v1125_v44, %v2988_v41  ;;  %v2999_v52 = vpack.c.bf16 %v1128_v13, %v1125_v44 }
 0x113   : > { %v682_v57 = vsel %vm674_vm3, 0.0, %v663_v42  ;;  %v691_v58 = vsel %vm674_vm3, %v663_v42, 0.0  ;;  %v680_v59 = vsel %vm674_vm3, 0.0, %v661_v43  ;;  %v689_v60 = vsel %vm674_vm3, %v661_v43, 0.0  ;;  %2459 = vmatmul.mubr.msk.bf16.vlgmr.msra.gmra.mrb[8].mxu1 %vm752_vm5, %v2964_v4 }
 0x114   : > { %v727_v61 = vrot.slane %v682_v57, 1  ;;  %v728_v62 = vrot.slane %v691_v58, 1  ;;  %v1138_v63 = vrot.slane %v682_v57, 2  ;;  %v1139_v0 = vrot.slane %v691_v58, 2  ;;  %2498 = vmatprep.mubr.msk.bf16.mxu0 %vm752_vm5, %v2997_v46  ;;  %2467 = vmatpush3.bf16.msra.mxu1 %v2938_v50 }
 0x115   : > { %v721_v9 = vrot.slane %v680_v59, 1  ;;  %v722_v10 = vrot.slane %v689_v60, 1  ;;  %v1132_v13 = vrot.slane %v680_v59, 2  ;;  %v1133_v14 = vrot.slane %v689_v60, 2  ;;  %2499 = vmatmul.mubr.msk.bf16.vlgmr.msra.gmra.mrb[8].mxu0 %vm752_vm5, %v2980_v28  ;;  %2738 = vmatprep.subr.msk.bf16.mxu1 %vm765_vm2, %v3004_v56 }
 0x116   : > { %v3023_v2 = vsel %vm674_vm3, 0.0, %v664_v48  ;;  %v692_v15 = vsel %vm674_vm3, %v664_v48, 0.0  ;;  %v662_v50 = vrot.slane %v644_v49, 7  ;;  %2507 = vmatpush3.bf16.msra.mxu0 %v2942_v53  ;;  %v714_v16 = vsel %vm230_vm1, %v712_v29, %v713_v30 }
 0x117   : > { %v730_v17 = vrot.slane %v3023_v2, 1  ;;  %v731_v18 = vrot.slane %v692_v15, 1  ;;  %v1141_v19 = vrot.slane %v3023_v2, 2  ;;  %v1142_v20 = vrot.slane %v692_v15, 2  ;;  %2742 = vmatprep.subr.msk.bf16.mxu0 %vm765_vm2, %v2239_v3  ;;  %v2267_v15 = vld [vmem:[%s3346_s2 + $0x28] sm:$0xf] }
 0x118   : > { %v681_v5 = vsel %vm674_vm3, 0.0, %v662_v50  ;;  %v690_v21 = vsel %vm674_vm3, %v662_v50, 0.0  ;;  %v3034_v22 = vpack.c.bf16 %v3023_v2, %v682_v57  ;;  %v3037_v7 = vpack.c.bf16 %v714_v16, %v2992_v45 }
 0x119   : > { %v724_v53 = vrot.slane %v681_v5, 1  ;;  %v725_v11 = vrot.slane %v690_v21, 1  ;;  %v1135_v23 = vrot.slane %v681_v5, 2  ;;  %v1136_v26 = vrot.slane %v690_v21, 2 }
 0x11a   : > { %v3039_v27 = vpack.c.bf16 %v681_v5, %v680_v59  ;;  %v3042_v29 = vpack.c.bf16 %v2957_v12, %v714_v16  ;;  %v1134_v30 = vsel %vm1119_vm4, %v1132_v13, %v1133_v14  ;;  %v1140_v32 = vsel %vm1119_vm4, %v1138_v63, %v1139_v0  ;;  %v2257_v13 = vld [vmem:[%s3346_s2 + $0x20] sm:$0xf]  ;;  %v2300_v16 = vld [vmem:[%s3346_s2 + $0x3c] sm:$0xf] }
 0x11b   : > { %v1137_v33 = vsel %vm1119_vm4, %v1135_v23, %v1136_v26  ;;  %v3048_v34 = vsel %vm1119_vm4, %v1141_v19, %v1142_v20  ;;  %v723_v36 = vsel %vm230_vm1, %v721_v9, %v722_v10  ;;  %v726_v37 = vsel %vm230_vm1, %v724_v53, %v725_v11 }
 0x11c   : > { %2462 = vmatprep.mubr.msk.bf16.mxu1 %vm752_vm5, %v3039_v27  ;;  %v3054_v38 = vpack.c.bf16 %v1137_v33, %v1134_v30  ;;  %v3057_v12 = vpack.c.bf16 %v3048_v34, %v1140_v32  ;;  %v3059_v42 = vpack.c.bf16 %v726_v37, %v723_v36  ;;  %v729_v43 = vsel %vm230_vm1, %v727_v61, %v728_v62 }
 0x11d   : > { %2463 = vmatmul.mubr.msk.bf16.gmra.mrb[12].mxu1 %vm752_vm5, %v3034_v22  ;;  %v732_v44 = vsel %vm230_vm1, %v730_v17, %v731_v18  ;;  %v3066_v48 = vpack.c.bf16 %v723_v36, %v2968_v6  ;;  %v3068_v49 = vpack.c.bf16 %v729_v43, %v726_v37  ;;  %v918_v60 = vsel %vm230_vm1, %v916_v47, %v917_v51 }
 0x11e   : > { %2468 = vmatprep.mubr.msk.bf16.mxu1 %vm752_vm5, %v3037_v7  ;;  %2502 = vmatprep.mubr.msk.bf16.mxu0 %vm752_vm5, %v3054_v38  ;;  %v3074_v58 = vpack.c.bf16 %v732_v44, %v729_v43  ;;  %v3086_v6 = vsel %vm1119_vm4, %v1384_v54, %v1385_v55  ;;  %v3091_v61 = vpack.c.bf16 %v680_v59, %v2953_v8  ;;  %v939_v51 = vsel %vm765_vm2, %v3004_v56, 0  ;;  %v2224_v54 = vld [vmem:[%s3346_s2 + $0xc] sm:$0xf]  ;;  %v2244_v8 = vld [vmem:[%s3346_s2 + $0x1c] sm:$0xf] }
 0x11f   : > { %2503 = vmatmul.mubr.msk.bf16.gmra.mrb[12].mxu0 %vm752_vm5, %v3057_v12  ;;  %v3094_v62 = vpack.c.bf16 %v1134_v30, %v2975_v25  ;;  %v3096_v63 = vpack.c.bf16 %v682_v57, %v681_v5  ;;  %v3098_v0 = vpack.c.bf16 %v1140_v32, %v1137_v33  ;;  %v3102_v39 = vpack.c.bf16 %v918_v60, %v732_v44  ;;  %v2258_v57 = vld [vmem:[%s3346_s2 + $0x24] sm:$0xf]  ;;  %v2286_v59 = vld [vmem:[%s3346_s2 + $0x34] sm:$0xf] }
 0x120   : > { %2508 = vmatprep.mubr.msk.bf16.mxu0 %vm752_vm5, %v3037_v7  ;;  %v2022_v47 = vpack.c.bf16 %v3086_v6, %v3048_v34  ;;  %v1309_v55 = vsel %vm765_vm2, %v2239_v3, 0  ;;  %v920_v25 = vpack.c.bf16 %v2992_v45, %v918_v60  ;;  %v1033_v56 = vsel %vm765_vm2, %v2224_v54, 0 }
 0x121   : > { %v1407_v45 = vsel %vm765_vm2, %v2244_v8, 0  ;;  %v1014_v3 = vpack.c.bf16 %v2949_v1, %v2931_v35  ;;  %v1388_v9 = vpack.c.bf16 %v2988_v41, %v3086_v6  ;;  %v1496_v10 = vsel %vm765_vm2, %v2258_v57, 0  ;;  %v2285_v41 = vld [vmem:[%s3346_s2 + $0x30] sm:$0xf] }
 0x122   : > { %v1809_v1 = vsel %vm765_vm2, %v2286_v59, 0  ;;  %v1564_v14 = vsel %vm765_vm2, %v2257_v13, 0  ;;  %v1877_v50 = vsel %vm765_vm2, %v2285_v41, 0  ;;  %v2029_v17 = vsel %vm765_vm2, %v2300_v16, 0 }
 0x125   : > { %2469 = vmatmul.mubr.msk.bf16.vlgmr.msra.gmra.mrb[8].mxu1 %vm752_vm5, %v2972_v24 }
 0x126   : > { %2472 = vmatprep.mubr.msk.bf16.mxu1 %vm752_vm5, %v3059_v42  ;;  %2477 = vmatpush3.bf16.msra.mxu1 %v939_v51 }
 0x127   : > { %2509 = vmatmul.mubr.msk.bf16.vlgmr.msra.gmra.mrb[8].mxu0 %vm752_vm5, %v2972_v24  ;;  %2739 = vmatprep.subr.msk.bf16.mxu1 %vm765_vm2, %v2224_v54 }
 0x128   : > { %2517 = vmatpush3.bf16.msra.mxu0 %v1309_v55  ;;  %2512 = vmatprep.mubr.msk.bf16.mxu0 %vm752_vm5, %v3059_v42 }
 0x129   : > { %2743 = vmatprep.subr.msk.bf16.mxu0 %vm765_vm2, %v2244_v8 }
 0x12d   : > { %2473 = vmatmul.mubr.msk.bf16.gmra.mrb[12].mxu1 %vm752_vm5, %v3074_v58 }
 0x12e   : > { %2478 = vmatprep.mubr.msk.bf16.mxu1 %vm752_vm5, %v920_v25 }
 0x12f   : > { %2513 = vmatmul.mubr.msk.bf16.gmra.mrb[12].mxu0 %vm752_vm5, %v3074_v58 }
 0x130   : > { %2518 = vmatprep.mubr.msk.bf16.mxu0 %vm752_vm5, %v920_v25 }
 0x135   : > { %2479 = vmatmul.mubr.msk.bf16.vlgmr.msra.gmra.mrb[8].mxu1 %vm752_vm5, %v3042_v29 }
 0x136   : > { %2482 = vmatprep.mubr.msk.bf16.mxu1 %vm752_vm5, %v3066_v48  ;;  %2487 = vmatpush3.bf16.msra.mxu1 %v1033_v56 }
 0x137   : > { %2519 = vmatmul.mubr.msk.bf16.vlgmr.msra.gmra.mrb[8].mxu0 %vm752_vm5, %v3042_v29  ;;  %2744 = vmatprep.subr.msk.bf16.mxu1 %vm765_vm2, %v2258_v57 }
 0x138   : > { %2527 = vmatpush3.bf16.msra.mxu0 %v1407_v45  ;;  %2522 = vmatprep.mubr.msk.bf16.mxu0 %vm752_vm5, %v3066_v48 }
 0x139   : > { %2748 = vmatprep.subr.msk.bf16.mxu0 %vm765_vm2, %v2286_v59 }
 0x13d   : > { %2483 = vmatmul.mubr.msk.bf16.gmra.mrb[12].mxu1 %vm752_vm5, %v3068_v49 }
 0x13e   : > { %2488 = vmatprep.mubr.msk.bf16.mxu1 %vm752_vm5, %v1014_v3 }
 0x13f   : > { %2523 = vmatmul.mubr.msk.bf16.gmra.mrb[12].mxu0 %vm752_vm5, %v3068_v49 }
 0x140   : > { %2528 = vmatprep.mubr.msk.bf16.mxu0 %vm752_vm5, %v1388_v9 }
 0x145   : > { %2489 = vmatmul.mubr.msk.bf16.vlgmr.msra.gmra.mrb[8].mxu1 %vm752_vm5, %v2982_v31 }
 0x146   : > { %2492 = vmatprep.mubr.msk.bf16.mxu1 %vm752_vm5, %v3091_v61  ;;  %2537 = vmatpush3.bf16.msra.mxu1 %v1496_v10 }
 0x147   : > { %2529 = vmatmul.mubr.msk.bf16.vlgmr.msra.gmra.mrb[8].mxu0 %vm752_vm5, %v2999_v52  ;;  %2745 = vmatprep.subr.msk.bf16.mxu1 %vm765_vm2, %v2257_v13 }
 0x148   : > { %2577 = vmatpush3.bf16.msra.mxu0 %v1809_v1  ;;  %2532 = vmatprep.mubr.msk.bf16.mxu0 %vm752_vm5, %v3094_v62 }
 0x149   : > { %2749 = vmatprep.subr.msk.bf16.mxu0 %vm765_vm2, %v2285_v41 }
 0x14d   : > { %2493 = vmatmul.mubr.msk.bf16.gmra.mrb[12].mxu1 %vm752_vm5, %v3096_v63 }
 0x14e   : > { %2538 = vmatprep.mubr.msk.bf16.mxu1 %vm752_vm5, %v2985_v40  ;;  %v2295_v40 = vld [vmem:[%s3346_s2 + $0x38] sm:$0xf] }
 0x14f   : > { %2533 = vmatmul.mubr.msk.bf16.gmra.mrb[12].mxu0 %vm752_vm5, %v3098_v0 }
 0x150   : > { %2578 = vmatprep.mubr.msk.bf16.mxu0 %vm752_vm5, %v2997_v46  ;;  %v1947_v46 = vsel %vm765_vm2, %v2295_v40, 0 }
 0x155   : > { %2539 = vmatmul.mubr.msk.bf16.vlgmr.msra.gmra.mrb[16].mxu1 %vm752_vm5, %v2964_v4  ;;  %v1638_v4 = vsel %vm765_vm2, %v2267_v15, 0 }
 0x156   : > { %2542 = vmatprep.mubr.msk.bf16.mxu1 %vm752_vm5, %v3039_v27  ;;  %2547 = vmatpush3.bf16.msra.mxu1 %v1564_v14 }
 0x157   : > { %2579 = vmatmul.mubr.msk.bf16.vlgmr.msra.gmra.mrb[16].mxu0 %vm752_vm5, %v2980_v28  ;;  %2746 = vmatprep.subr.msk.bf16.mxu1 %vm765_vm2, %v2267_v15  ;;  %v2272_v28 = vld [vmem:[%s3346_s2 + $0x2c] sm:$0xf] }
 0x158   : > { %2587 = vmatpush3.bf16.msra.mxu0 %v1877_v50  ;;  %2582 = vmatprep.mubr.msk.bf16.mxu0 %vm752_vm5, %v3054_v38 }
 0x159   : > { %2750 = vmatprep.subr.msk.bf16.mxu0 %vm765_vm2, %v2295_v40 }
 0x15d   : > { %2543 = vmatmul.mubr.msk.bf16.gmra.mrb[20].mxu1 %vm752_vm5, %v3034_v22 }
 0x15e   : > { %2548 = vmatprep.mubr.msk.bf16.mxu1 %vm752_vm5, %v3037_v7 }
 0x15f   : > { %2583 = vmatmul.mubr.msk.bf16.gmra.mrb[20].mxu0 %vm752_vm5, %v3057_v12 }
 0x160   : > { %2588 = vmatprep.mubr.msk.bf16.mxu0 %vm752_vm5, %v3037_v7 }
 0x165   : > { %2549 = vmatmul.mubr.msk.bf16.vlgmr.msra.gmra.mrb[16].mxu1 %vm752_vm5, %v2972_v24 }
 0x166   : > { %2552 = vmatprep.mubr.msk.bf16.mxu1 %vm752_vm5, %v3059_v42  ;;  %2557 = vmatpush3.bf16.msra.mxu1 %v1638_v4 }
 0x167   : > { %2589 = vmatmul.mubr.msk.bf16.vlgmr.msra.gmra.mrb[16].mxu0 %vm752_vm5, %v2972_v24  ;;  %2747 = vmatprep.subr.msk.bf16.mxu1 %vm765_vm2, %v2272_v28  ;;  %v1720_v24 = vsel %vm765_vm2, %v2272_v28, 0 }
 0x168   : > { %2597 = vmatpush3.bf16.msra.mxu0 %v1947_v46  ;;  %2592 = vmatprep.mubr.msk.bf16.mxu0 %vm752_vm5, %v3059_v42 }
 0x169   : > { %2751 = vmatprep.subr.msk.bf16.mxu0 %vm765_vm2, %v2300_v16 }
 0x16d   : > { %2553 = vmatmul.mubr.msk.bf16.gmra.mrb[20].mxu1 %vm752_vm5, %v3074_v58 }
 0x16e   : > { %2558 = vmatprep.mubr.msk.bf16.mxu1 %vm752_vm5, %v3042_v29 }
 0x16f   : > { %2593 = vmatmul.mubr.msk.bf16.gmra.mrb[20].mxu0 %vm752_vm5, %v3074_v58 }
 0x170   : > { %2598 = vmatprep.mubr.msk.bf16.mxu0 %vm752_vm5, %v3042_v29 }
 0x175   : > { %2559 = vmatmul.mubr.msk.bf16.vlgmr.msra.gmra.mrb[16].mxu1 %vm752_vm5, %v3066_v48 }
 0x176   : > { %2562 = vmatprep.mubr.msk.bf16.mxu1 %vm752_vm5, %v3068_v49  ;;  %2567 = vmatpush3.bf16.msra.mxu1 %v1720_v24 }
 0x177   : > { %2599 = vmatmul.mubr.msk.bf16.vlgmr.msra.gmra.mrb[16].mxu0 %vm752_vm5, %v3066_v48 }
 0x178   : > { %2607 = vmatpush3.bf16.msra.mxu0 %v2029_v17  ;;  %2602 = vmatprep.mubr.msk.bf16.mxu0 %vm752_vm5, %v3068_v49 }
 0x17d   : > { %2563 = vmatmul.mubr.msk.bf16.gmra.mrb[20].mxu1 %vm752_vm5, %v3102_v39 }
 0x17e   : > { %2568 = vmatprep.mubr.msk.bf16.mxu1 %vm752_vm5, %v2982_v31  ;;  %v1713_v31 = vpack.c.bf16 %v2931_v35, %v3023_v2 }
 0x17f   : > { %2603 = vmatmul.mubr.msk.bf16.gmra.mrb[20].mxu0 %vm752_vm5, %v3102_v39 }
 0x180   : > { %2608 = vmatprep.mubr.msk.bf16.mxu0 %vm752_vm5, %v2999_v52 }
 0x185   : > { %2569 = vmatmul.mubr.msk.bf16.vlgmr.msra.gmra.mrb[16].mxu1 %vm752_vm5, %v3091_v61 }
 0x186   : > { %2572 = vmatprep.mubr.msk.bf16.mxu1 %vm752_vm5, %v3096_v63 }
 0x187   : > { %2609 = vmatmul.mubr.msk.bf16.vlgmr.msra.gmra.mrb[16].mxu0 %vm752_vm5, %v3094_v62 }
 0x188   : > { %2612 = vmatprep.mubr.msk.bf16.mxu0 %vm752_vm5, %v3098_v0 }
 0x18d   : > { %2573 = vmatmul.mubr.msk.bf16.gmra.mrb[20].mxu1 %vm752_vm5, %v1713_v31 }
 0x18f   : > { %2613 = vmatmul.mubr.msk.bf16.gmra.mrb[20].mxu0 %vm752_vm5, %v2022_v47 }
 0x218   : > { %v2490_v35 = vpop.f32.mrb[8].mxu1 }
 0x219   : > { %1111 = vst.msk [vmem:[%s3275_s9 + $0x10] sm:$0xff] %vm1108_vm6, %v2490_v35  ;;  %v1069_v52 = vpop.f32.mrb[9].mxu1 }
 0x21a   : > { %1109 = vst.msk [vmem:[%s3275_s9] sm:$0xff] %vm1108_vm6, %v1069_v52  ;;  %v2491_v2 = vpop.f32.mrb[10].mxu1  ;;  %v2530_v18 = vpop.f32.mrb[8].mxu0 }
 0x21b   : > { %1112 = vst.msk [vmem:[%s3275_s9 + $0x18] sm:$0xff] %vm1108_vm6, %v2491_v2  ;;  %v1072_v19 = vpop.f32.mrb[11].mxu1  ;;  %2251 = vst.msk [vmem:[%s3275_s9 + $0x50] sm:$0xff] %vm1108_vm6, %v2530_v18  ;;  %v1443_v20 = vpop.f32.mrb[9].mxu0 }
 0x21c   : > { %1110 = vst.msk [vmem:[%s3275_s9 + $0x8] sm:$0xff] %vm1108_vm6, %v1072_v19  ;;  %2249 = vst.msk [vmem:[%s3275_s9 + $0x40] sm:$0xff] %vm1108_vm6, %v1443_v20  ;;  %v2531_v5 = vpop.f32.mrb[10].mxu0 }
 0x21d   : > { %2252 = vst.msk [vmem:[%s3275_s9 + $0x58] sm:$0xff] %vm1108_vm6, %v2531_v5  ;;  %v1446_v21 = vpop.f32.mrb[11].mxu0 }
 0x21e   : > { %2250 = vst.msk [vmem:[%s3275_s9 + $0x48] sm:$0xff] %vm1108_vm6, %v1446_v21 }
 0x220   : > { %v2494_v22 = vpop.f32.mrb[12].mxu1 }
 0x221   : > { %1115 = vst.msk [vmem:[%s3275_s9 + $0x30] sm:$0xff] %vm1108_vm6, %v2494_v22  ;;  %v1085_v7 = vpop.f32.mrb[13].mxu1 }
 0x222   : > { %1113 = vst.msk [vmem:[%s3275_s9 + $0x20] sm:$0xff] %vm1108_vm6, %v1085_v7  ;;  %v2495_v53 = vpop.f32.mrb[14].mxu1  ;;  %v2534_v11 = vpop.f32.mrb[12].mxu0 }
 0x223   : > { %1116 = vst.msk [vmem:[%s3275_s9 + $0x38] sm:$0xff] %vm1108_vm6, %v2495_v53  ;;  %v1088_v23 = vpop.f32.mrb[15].mxu1  ;;  %2255 = vst.msk [vmem:[%s3275_s9 + $0x70] sm:$0xff] %vm1108_vm6, %v2534_v11  ;;  %v1459_v26 = vpop.f32.mrb[13].mxu0 }
 0x224   : > { %1114 = vst.msk [vmem:[%s3275_s9 + $0x28] sm:$0xff] %vm1108_vm6, %v1088_v23  ;;  %2253 = vst.msk [vmem:[%s3275_s9 + $0x60] sm:$0xff] %vm1108_vm6, %v1459_v26  ;;  %v2535_v27 = vpop.f32.mrb[14].mxu0 }
 0x225   : > { %2256 = vst.msk [vmem:[%s3275_s9 + $0x78] sm:$0xff] %vm1108_vm6, %v2535_v27  ;;  %v1462_v29 = vpop.f32.mrb[15].mxu0 }
 0x226   : > { %2254 = vst.msk [vmem:[%s3275_s9 + $0x68] sm:$0xff] %vm1108_vm6, %v1462_v29 }
 0x258   : > { %v2570_v30 = vpop.f32.mrb[16].mxu1 }
 0x259   : > { %2279 = vst.msk [vmem:[%s3275_s9 + $0x90] sm:$0xff] %vm1108_vm6, %v2570_v30  ;;  %v1756_v32 = vpop.f32.mrb[17].mxu1 }
 0x25a   : > { %2277 = vst.msk [vmem:[%s3275_s9 + $0x80] sm:$0xff] %vm1108_vm6, %v1756_v32  ;;  %v2571_v33 = vpop.f32.mrb[18].mxu1  ;;  %v2610_v34 = vpop.f32.mrb[16].mxu0 }
 0x25b   : > { %2280 = vst.msk [vmem:[%s3275_s9 + $0x98] sm:$0xff] %vm1108_vm6, %v2571_v33  ;;  %v1759_v36 = vpop.f32.mrb[19].mxu1  ;;  %2307 = vst.msk [vmem:[%s3275_s9 + $0xd0] sm:$0xff] %vm1108_vm6, %v2610_v34  ;;  %v2065_v37 = vpop.f32.mrb[17].mxu0 }
 0x25c   : > { %2278 = vst.msk [vmem:[%s3275_s9 + $0x88] sm:$0xff] %vm1108_vm6, %v1759_v36  ;;  %2305 = vst.msk [vmem:[%s3275_s9 + $0xc0] sm:$0xff] %vm1108_vm6, %v2065_v37  ;;  %v2611_v38 = vpop.f32.mrb[18].mxu0 }
 0x25d   : > { %2308 = vst.msk [vmem:[%s3275_s9 + $0xd8] sm:$0xff] %vm1108_vm6, %v2611_v38  ;;  %v2068_v12 = vpop.f32.mrb[19].mxu0 }
 0x25e   : > { %2306 = vst.msk [vmem:[%s3275_s9 + $0xc8] sm:$0xff] %vm1108_vm6, %v2068_v12 }
 0x260   : > { %v2574_v42 = vpop.f32.mrb[20].mxu1 }
 0x261   : > { %2283 = vst.msk [vmem:[%s3275_s9 + $0xb0] sm:$0xff] %vm1108_vm6, %v2574_v42  ;;  %v1772_v43 = vpop.f32.mrb[21].mxu1 }
 0x262   : > { %2281 = vst.msk [vmem:[%s3275_s9 + $0xa0] sm:$0xff] %vm1108_vm6, %v1772_v43  ;;  %v2575_v44 = vpop.f32.mrb[22].mxu1  ;;  %v2614_v48 = vpop.f32.mrb[20].mxu0 }
 0x263   : > { %2284 = vst.msk [vmem:[%s3275_s9 + $0xb8] sm:$0xff] %vm1108_vm6, %v2575_v44  ;;  %v1775_v49 = vpop.f32.mrb[23].mxu1  ;;  %2311 = vst.msk [vmem:[%s3275_s9 + $0xf0] sm:$0xff] %vm1108_vm6, %v2614_v48  ;;  %v2081_v58 = vpop.f32.mrb[21].mxu0 }
 0x264   : > { %2282 = vst.msk [vmem:[%s3275_s9 + $0xa8] sm:$0xff] %vm1108_vm6, %v1775_v49  ;;  %2309 = vst.msk [vmem:[%s3275_s9 + $0xe0] sm:$0xff] %vm1108_vm6, %v2081_v58  ;;  %v2615_v60 = vpop.f32.mrb[22].mxu0 }
 0x265   : > { %2312 = vst.msk [vmem:[%s3275_s9 + $0xf8] sm:$0xff] %vm1108_vm6, %v2615_v60  ;;  %v2084_v6 = vpop.f32.mrb[23].mxu0 }
 0x266   : > { %2310 = vst.msk [vmem:[%s3275_s9 + $0xe8] sm:$0xff] %vm1108_vm6, %v2084_v6 }
 0x267 PF: > { %s13_s12 = sadd.s32 1, %s2780_s12  }
 0x268   : > { %p10_p4 = scmp.ge.s32.totalorder %s13_s12, 4  }
 0x26a   :  { %12 = sbr.rel (!%p10_p4) target bundleno = 1 (0x1), region = 83 }

</bundles_post_ra>
